<compile_context>
chip_gen: v7x
topology: tpu7x:2x2x1
jax: 0.10.0
libtpu: 0.0.40
codegen_flags: <defaults>
</compile_context>

<pallas_src>
import functools

import numpy as np
import jax
import jax.numpy as jnp
from jax.experimental import pallas as pl
from jax.experimental.pallas import tpu as pltpu


# Left lane-pad of the flat activations. 128 keeps the in-kernel staging store of the
# intermediate feature map lane-aligned; the right pad only needs W+1 zeros.
LPAD = 128


def _round_up(x, m):
    return (x + m - 1) // m * m


def _nconv2d_kernel(x_ref, w1_ref, w2_ref, o_ref,
                    taps1_ref, yscr_ref, taps2_ref,
                    *, H, W, eps, slope):
    """Fused conv1 + InstanceNorm + LeakyReLU + (2x nearest upsample . conv2), one sample.

    x_ref   : [Cin_p, LPAD + H*W + W + 1]  flat NCHW rows, zero lane-padded
    w1_ref  : [Cout, 9 * Cin_p]
    w2_ref  : [4*OutPool, 9 * Cout]        phase-collapsed (upsample+conv) weights
    o_ref   : [4*OutPool, H*W]             rows = (a, b, co2) phases, cols = low-res H*W
    """
    HW = H * W

    # Column-edge masks for the horizontal taps; vertical edges are handled by the
    # zero lane-padding of the flat buffers.
    col = jax.lax.broadcasted_iota(jnp.int32, (1, HW), 1) % W
    not_left = col != 0          # valid lanes for a dx == -1 tap
    not_right = col != (W - 1)   # valid lanes for a dx == +1 tap

    def build_taps(src_ref, dst_ref):
        # src_ref: [rows, LPAD + HW + W + 1] flat zero-padded activation
        # dst_ref: [9 * rows, HW] stacked 3x3 shifted taps (tap-major, channel-minor)
        rows = src_ref.shape[0]
        for dy in (-1, 0, 1):
            for dx in (-1, 0, 1):
                t = (dy + 1) * 3 + (dx + 1)
                tap = src_ref[:, pl.ds(LPAD + dy * W + dx, HW)]
                if dx == -1:
                    tap = jnp.where(not_left, tap, 0.0)
                elif dx == 1:
                    tap = jnp.where(not_right, tap, 0.0)
                dst_ref[pl.ds(t * rows, rows), :] = tap

    # ---- conv1: one MXU matmul over the full 9*Cin_p contraction -------------------
    build_taps(x_ref, taps1_ref)
    y = jnp.dot(w1_ref[...], taps1_ref[...],
                preferred_element_type=jnp.float32)            # [Cout, HW]

    # ---- InstanceNorm2d(affine=False, eps=1e-5): per-channel stats over H*W (lanes) -
    mean = jnp.mean(y, axis=1, keepdims=True)
    var = jnp.mean((y - mean) ** 2, axis=1, keepdims=True)
    y = (y - mean) * jax.lax.rsqrt(var + eps)
    # ---- LeakyReLU(0.2) -------------------------------------------------------------
    y = jnp.where(y >= 0, y, slope * y)

    # ---- stage y as a flat zero-padded buffer for the second set of taps ------------
    yscr_ref[...] = jnp.zeros_like(yscr_ref)
    yscr_ref[:, pl.ds(LPAD, HW)] = y

    # ---- 2x nearest upsample + conv2, collapsed into one low-res matmul -------------
    build_taps(yscr_ref, taps2_ref)
    z = jnp.dot(w2_ref[...], taps2_ref[...],
                preferred_element_type=jnp.float32)            # [4*OutPool, HW]
    o_ref[...] = z.astype(o_ref.dtype)


def prepare_weights(w1_hwio, w2_hwio):
    """One-time host-side weight massaging into the lane-friendly slabs the kernel wants."""
    k, k2, cin, cout = w1_hwio.shape
    assert k == 3 and k2 == 3, "fused kernel assumes 3x3 / stride=1 / padding=1"
    assert cout % 8 == 0, "conv1 output channels must be a multiple of 8"
    out_pool = w2_hwio.shape[-1]
    cin_p = _round_up(cin, 8)

    # conv1: [Cout, (ky, kx, ci_padded)] -- same (ky, kx, ci) order as the in-kernel taps.
    w1 = jnp.transpose(w1_hwio, (3, 0, 1, 2))                        # [Cout, 3, 3, Cin]
    w1 = jnp.pad(w1, ((0, 0), (0, 0), (0, 0), (0, cin_p - cin)))
    w1_eff = w1.reshape(cout, k * k * cin_p)

    # conv2 fused with the 2x nearest upsample: for output phase (a, b) in {0,1}^2, the
    # hi-res tap (ky, kx) reads the LOW-res pixel at offset
    # (floor((a+ky-1)/2), floor((b+kx-1)/2)); m[] encodes that mapping so the
    # (upsample . conv2) pair becomes one low-res conv per phase.
    m = np.zeros((2, 3, 3), np.float32)
    for a in range(2):
        for ky in range(3):
            m[a, ky, (a + ky - 1) // 2 + 1] = 1.0
    m = jnp.asarray(m)
    # w2_hwio axes: [ky, kx, Cout(in), OutPool(out)]
    w2_eff = jnp.einsum("ayp,bxq,yxio->abopqi", m, m, w2_hwio)
    w2_eff = w2_eff.reshape(2 * 2 * out_pool, k * k * cout)          # rows = (a, b, co2)
    return w1_eff, w2_eff


def nconv2d_forward(x_nchw, w1_eff, w2_eff):
    """x: [N, Cin, H, W] -> [N, OutPool, 2H, 2W] (NCHW), matching nConv2d.forward."""
    n, cin, h, w = x_nchw.shape
    cin_p = w1_eff.shape[1] // 9
    cout = w2_eff.shape[1] // 9
    out_pool4 = w2_eff.shape[0]
    hw = h * w
    rpad = w + 1
    hwp = LPAD + hw + rpad

    # Flatten the NCHW rows onto the lane dim and zero-pad the lanes (and channels up to
    # a sublane multiple); the kernel builds the 3x3 taps from this with static
    # lane-offset loads -- no im2col blow-up in HBM.
    x_flat = jnp.pad(x_nchw.reshape(n, cin, hw),
                     ((0, 0), (0, cin_p - cin), (LPAD, rpad)))

    kernel = functools.partial(_nconv2d_kernel, H=h, W=w, eps=1e-5, slope=0.2)

    z = pl.pallas_call(
        kernel,
        out_shape=jax.ShapeDtypeStruct((n, out_pool4, hw), jnp.float32),
        grid=(n,),
        in_specs=[
            pl.BlockSpec((None, cin_p, hwp), lambda i: (i, 0, 0)),
            pl.BlockSpec((cout, 9 * cin_p), lambda i: (0, 0)),        # resident weights
            pl.BlockSpec((out_pool4, 9 * cout), lambda i: (0, 0)),    # resident weights
        ],
        out_specs=pl.BlockSpec((None, out_pool4, hw), lambda i: (i, 0, 0)),
        scratch_shapes=[
            pltpu.VMEM((9 * cin_p, hw), jnp.float32),   # conv1 tap stack
            pltpu.VMEM((cout, hwp), jnp.float32),       # flat zero-padded intermediate y
            pltpu.VMEM((9 * cout, hw), jnp.float32),    # conv2 tap stack
        ],
        compiler_params=pltpu.CompilerParams(dimension_semantics=("parallel",)),
    )(x_flat, w1_eff, w2_eff)

    # depth-to-space: row (a, b, co2) at low-res (i, j)  ->  NCHW [co2, 2i+a, 2j+b]
    out_pool = out_pool4 // 4
    z = z.reshape(n, 2, 2, out_pool, h, w)
    z = jnp.transpose(z, (0, 3, 4, 1, 5, 2))
    return z.reshape(n, out_pool, 2 * h, 2 * w)


def nconv2d_reference(x_nchw, w1_hwio, w2_hwio, eps=1e-5, slope=0.2):
    """Plain-XLA reference of the same forward pass (correctness check)."""
    dn = ("NHWC", "HWIO", "NHWC")
    x = jnp.transpose(x_nchw, (0, 2, 3, 1))
    y = jax.lax.conv_general_dilated(x, w1_hwio, (1, 1), "SAME", dimension_numbers=dn)
    mean = jnp.mean(y, axis=(1, 2), keepdims=True)
    var = jnp.mean((y - mean) ** 2, axis=(1, 2), keepdims=True)
    y = (y - mean) * jax.lax.rsqrt(var + eps)
    y = jnp.where(y >= 0, y, slope * y)
    y = jnp.repeat(jnp.repeat(y, 2, axis=1), 2, axis=2)
    z = jax.lax.conv_general_dilated(y, w2_hwio, (1, 1), "SAME", dimension_numbers=dn)
    return jnp.transpose(z, (0, 3, 1, 2))


if __name__ == "__main__":
    # Module config: nConv2d(nch_in=4, nch_out=8, kernel_size=3, stride=1, padding=1,
    #                        bias=False, relu=0.0, norm=0, pool=1, out_pool=4)
    N, CIN, COUT, OUT_POOL, H, W, K = 2, 4, 8, 4, 16, 16, 3

    key = jax.random.PRNGKey(0)
    kx, k1, k2 = jax.random.split(key, 3)
    x = jax.random.normal(kx, (N, CIN, H, W), jnp.float32)
    # Synthetic conv weights stored HWIO (torch layout would be [Cout, Cin, K, K]).
    w1 = jax.random.normal(k1, (K, K, CIN, COUT), jnp.float32) / jnp.sqrt(K * K * CIN)
    w2 = jax.random.normal(k2, (K, K, COUT, OUT_POOL), jnp.float32) / jnp.sqrt(K * K * COUT)

    # One-time, host-side weight massaging (kept outside the jitted forward).
    w1_eff, w2_eff = prepare_weights(w1, w2)

    out = jax.jit(nconv2d_forward)(x, w1_eff, w2_eff)
    jax.block_until_ready(out)
    assert out.shape == (N, OUT_POOL, 2 * H, 2 * W), out.shape

    # Correctness check against a plain-XLA reference of the same forward pass.
    ref = nconv2d_reference(x, w1, w2)
    err = float(jnp.max(jnp.abs(out - ref)))
    scale = float(jnp.max(jnp.abs(ref)))
    assert err <= 5e-2 * scale + 1e-5, (err, scale)

    print("KERNEL_OK")
</pallas_src>

<mosaic_0001>
module attributes {stable_mosaic.version = 11 : i64} {
  func.func @_nconv2d_kernel(%arg0: i32, %arg1: memref<1x8x401xf32, #tpu.memory_space<vmem>>, %arg2: memref<8x72xf32, #tpu.memory_space<vmem>>, %arg3: memref<16x72xf32, #tpu.memory_space<vmem>>, %arg4: memref<1x16x256xf32, #tpu.memory_space<vmem>>, %arg5: memref<72x256xf32, #tpu.memory_space<vmem>>, %arg6: memref<8x401xf32, #tpu.memory_space<vmem>>, %arg7: memref<72x256xf32, #tpu.memory_space<vmem>>) attributes {dimension_semantics = [#tpu.dimension_semantics<parallel>], iteration_bounds = array<i64: 2>, scalar_prefetch = 0 : i64, scratch_operands = 3 : i64, tpu.core_type = #tpu.core_type<tc>, window_params = [{transform_indices = @transform_0, window_bounds = array<i64: 1, 8, 401>}, {pipeline_mode = #tpu.pipeline_mode<synchronous>, transform_indices = @transform_1, window_bounds = array<i64: 8, 72>}, {pipeline_mode = #tpu.pipeline_mode<synchronous>, transform_indices = @transform_2, window_bounds = array<i64: 16, 72>}, {transform_indices = @transform_3, window_bounds = array<i64: 1, 16, 256>}]} {
    %0 = tpu.iota {dimensions = array<i32: 1>} : vector<1x256xi32>
    %c16_i32 = arith.constant 16 : i32
    %c0_i32 = arith.constant 0 : i32
    %1 = arith.cmpi eq, %c16_i32, %c0_i32 : i32
    %c1_i32 = arith.constant 1 : i32
    %2 = arith.select %1, %c1_i32, %c16_i32 : i32
    %3 = vector.broadcast %2 : i32 to vector<1x256xi32>
    %4 = arith.remsi %0, %3 : vector<1x256xi32>
    %c0_i32_0 = arith.constant 0 : i32
    %5 = vector.broadcast %c0_i32_0 : i32 to vector<1x256xi32>
    %6 = arith.cmpi ne, %4, %5 : vector<1x256xi32>
    %c0_i32_1 = arith.constant 0 : i32
    %7 = vector.broadcast %c0_i32_1 : i32 to vector<1x256xi32>
    %8 = arith.cmpi slt, %4, %7 : vector<1x256xi32>
    %c0_i32_2 = arith.constant 0 : i32
    %9 = arith.cmpi slt, %2, %c0_i32_2 : i32
    %10 = vector.broadcast %9 : i1 to vector<1x256xi1>
    %11 = vector.broadcast %10 : vector<1x256xi1> to vector<1x256xi1>
    %12 = arith.xori %8, %11 : vector<1x256xi1>
    %13 = arith.andi %12, %6 : vector<1x256xi1>
    %14 = vector.broadcast %2 : i32 to vector<1x256xi32>
    %15 = arith.addi %4, %14 : vector<1x256xi32>
    %16 = arith.select %13, %15, %4 : vector<1x256xi1>, vector<1x256xi32>
    %c0_i32_3 = arith.constant 0 : i32
    %17 = vector.broadcast %c0_i32_3 : i32 to vector<1x256xi32>
    %18 = arith.cmpi ne, %16, %17 : vector<1x256xi32>
    %c15_i32 = arith.constant 15 : i32
    %19 = vector.broadcast %c15_i32 : i32 to vector<1x256xi32>
    %20 = arith.cmpi ne, %16, %19 : vector<1x256xi32>
    %c0 = arith.constant 0 : index
    %c0_4 = arith.constant 0 : index
    %c111 = arith.constant 111 : index
    %21 = vector.load %arg1[%c0, %c0_4, %c111] : memref<1x8x401xf32, #tpu.memory_space<vmem>>, vector<1x8x256xf32>
    %22 = vector.shape_cast %21 : vector<1x8x256xf32> to vector<8x256xf32>
    %cst = arith.constant 0.000000e+00 : f32
    %23 = vector.shape_cast %18 : vector<1x256xi1> to vector<1x256xi1>
    %24 = vector.broadcast %23 : vector<1x256xi1> to vector<8x256xi1>
    %25 = vector.broadcast %cst : f32 to vector<8x256xf32>
    %26 = arith.select %24, %22, %25 : vector<8x256xi1>, vector<8x256xf32>
    %c0_5 = arith.constant 0 : index
    %c0_6 = arith.constant 0 : index
    %27 = vector.load %arg5[%c0_5, %c0_6] : memref<72x256xf32, #tpu.memory_space<vmem>>, vector<8x256xf32>
    tpu.vector_store %arg5[%c0_5, %c0_6], %26 {strides = array<i32>} : memref<72x256xf32, #tpu.memory_space<vmem>>, vector<8x256xf32>,
    %c0_7 = arith.constant 0 : index
    %c0_8 = arith.constant 0 : index
    %c112 = arith.constant 112 : index
    %28 = vector.load %arg1[%c0_7, %c0_8, %c112] : memref<1x8x401xf32, #tpu.memory_space<vmem>>, vector<1x8x256xf32>
    %29 = vector.shape_cast %28 : vector<1x8x256xf32> to vector<8x256xf32>
    %c8 = arith.constant 8 : index
    %c0_9 = arith.constant 0 : index
    %30 = vector.load %arg5[%c8, %c0_9] : memref<72x256xf32, #tpu.memory_space<vmem>>, vector<8x256xf32>
    tpu.vector_store %arg5[%c8, %c0_9], %29 {strides = array<i32>} : memref<72x256xf32, #tpu.memory_space<vmem>>, vector<8x256xf32>,
    %c0_10 = arith.constant 0 : index
    %c0_11 = arith.constant 0 : index
    %c113 = arith.constant 113 : index
    %31 = vector.load %arg1[%c0_10, %c0_11, %c113] : memref<1x8x401xf32, #tpu.memory_space<vmem>>, vector<1x8x256xf32>
    %32 = vector.shape_cast %31 : vector<1x8x256xf32> to vector<8x256xf32>
    %cst_12 = arith.constant 0.000000e+00 : f32
    %33 = vector.shape_cast %20 : vector<1x256xi1> to vector<1x256xi1>
    %34 = vector.broadcast %33 : vector<1x256xi1> to vector<8x256xi1>
    %35 = vector.broadcast %cst_12 : f32 to vector<8x256xf32>
    %36 = arith.select %34, %32, %35 : vector<8x256xi1>, vector<8x256xf32>
    %c16 = arith.constant 16 : index
    %c0_13 = arith.constant 0 : index
    %37 = vector.load %arg5[%c16, %c0_13] : memref<72x256xf32, #tpu.memory_space<vmem>>, vector<8x256xf32>
    tpu.vector_store %arg5[%c16, %c0_13], %36 {strides = array<i32>} : memref<72x256xf32, #tpu.memory_space<vmem>>, vector<8x256xf32>,
    %c0_14 = arith.constant 0 : index
    %c0_15 = arith.constant 0 : index
    %c127 = arith.constant 127 : index
    %38 = vector.load %arg1[%c0_14, %c0_15, %c127] : memref<1x8x401xf32, #tpu.memory_space<vmem>>, vector<1x8x256xf32>
    %39 = vector.shape_cast %38 : vector<1x8x256xf32> to vector<8x256xf32>
    %cst_16 = arith.constant 0.000000e+00 : f32
    %40 = vector.shape_cast %18 : vector<1x256xi1> to vector<1x256xi1>
    %41 = vector.broadcast %40 : vector<1x256xi1> to vector<8x256xi1>
    %42 = vector.broadcast %cst_16 : f32 to vector<8x256xf32>
    %43 = arith.select %41, %39, %42 : vector<8x256xi1>, vector<8x256xf32>
    %c24 = arith.constant 24 : index
    %c0_17 = arith.constant 0 : index
    %44 = vector.load %arg5[%c24, %c0_17] : memref<72x256xf32, #tpu.memory_space<vmem>>, vector<8x256xf32>
    tpu.vector_store %arg5[%c24, %c0_17], %43 {strides = array<i32>} : memref<72x256xf32, #tpu.memory_space<vmem>>, vector<8x256xf32>,
    %c0_18 = arith.constant 0 : index
    %c0_19 = arith.constant 0 : index
    %c128 = arith.constant 128 : index
    %45 = vector.load %arg1[%c0_18, %c0_19, %c128] : memref<1x8x401xf32, #tpu.memory_space<vmem>>, vector<1x8x256xf32>
    %46 = vector.shape_cast %45 : vector<1x8x256xf32> to vector<8x256xf32>
    %c32 = arith.constant 32 : index
    %c0_20 = arith.constant 0 : index
    %47 = vector.load %arg5[%c32, %c0_20] : memref<72x256xf32, #tpu.memory_space<vmem>>, vector<8x256xf32>
    tpu.vector_store %arg5[%c32, %c0_20], %46 {strides = array<i32>} : memref<72x256xf32, #tpu.memory_space<vmem>>, vector<8x256xf32>,
    %c0_21 = arith.constant 0 : index
    %c0_22 = arith.constant 0 : index
    %c129 = arith.constant 129 : index
    %48 = vector.load %arg1[%c0_21, %c0_22, %c129] : memref<1x8x401xf32, #tpu.memory_space<vmem>>, vector<1x8x256xf32>
    %49 = vector.shape_cast %48 : vector<1x8x256xf32> to vector<8x256xf32>
    %cst_23 = arith.constant 0.000000e+00 : f32
    %50 = vector.shape_cast %20 : vector<1x256xi1> to vector<1x256xi1>
    %51 = vector.broadcast %50 : vector<1x256xi1> to vector<8x256xi1>
    %52 = vector.broadcast %cst_23 : f32 to vector<8x256xf32>
    %53 = arith.select %51, %49, %52 : vector<8x256xi1>, vector<8x256xf32>
    %c40 = arith.constant 40 : index
    %c0_24 = arith.constant 0 : index
    %54 = vector.load %arg5[%c40, %c0_24] : memref<72x256xf32, #tpu.memory_space<vmem>>, vector<8x256xf32>
    tpu.vector_store %arg5[%c40, %c0_24], %53 {strides = array<i32>} : memref<72x256xf32, #tpu.memory_space<vmem>>, vector<8x256xf32>,
    %c0_25 = arith.constant 0 : index
    %c0_26 = arith.constant 0 : index
    %c143 = arith.constant 143 : index
    %55 = vector.load %arg1[%c0_25, %c0_26, %c143] : memref<1x8x401xf32, #tpu.memory_space<vmem>>, vector<1x8x256xf32>
    %56 = vector.shape_cast %55 : vector<1x8x256xf32> to vector<8x256xf32>
    %cst_27 = arith.constant 0.000000e+00 : f32
    %57 = vector.shape_cast %18 : vector<1x256xi1> to vector<1x256xi1>
    %58 = vector.broadcast %57 : vector<1x256xi1> to vector<8x256xi1>
    %59 = vector.broadcast %cst_27 : f32 to vector<8x256xf32>
    %60 = arith.select %58, %56, %59 : vector<8x256xi1>, vector<8x256xf32>
    %c48 = arith.constant 48 : index
    %c0_28 = arith.constant 0 : index
    %61 = vector.load %arg5[%c48, %c0_28] : memref<72x256xf32, #tpu.memory_space<vmem>>, vector<8x256xf32>
    tpu.vector_store %arg5[%c48, %c0_28], %60 {strides = array<i32>} : memref<72x256xf32, #tpu.memory_space<vmem>>, vector<8x256xf32>,
    %c0_29 = arith.constant 0 : index
    %c0_30 = arith.constant 0 : index
    %c144 = arith.constant 144 : index
    %62 = vector.load %arg1[%c0_29, %c0_30, %c144] : memref<1x8x401xf32, #tpu.memory_space<vmem>>, vector<1x8x256xf32>
    %63 = vector.shape_cast %62 : vector<1x8x256xf32> to vector<8x256xf32>
    %c56 = arith.constant 56 : index
    %c0_31 = arith.constant 0 : index
    %64 = vector.load %arg5[%c56, %c0_31] : memref<72x256xf32, #tpu.memory_space<vmem>>, vector<8x256xf32>
    tpu.vector_store %arg5[%c56, %c0_31], %63 {strides = array<i32>} : memref<72x256xf32, #tpu.memory_space<vmem>>, vector<8x256xf32>,
    %c0_32 = arith.constant 0 : index
    %c0_33 = arith.constant 0 : index
    %c145 = arith.constant 145 : index
    %65 = vector.load %arg1[%c0_32, %c0_33, %c145] : memref<1x8x401xf32, #tpu.memory_space<vmem>>, vector<1x8x256xf32>
    %66 = vector.shape_cast %65 : vector<1x8x256xf32> to vector<8x256xf32>
    %cst_34 = arith.constant 0.000000e+00 : f32
    %67 = vector.shape_cast %20 : vector<1x256xi1> to vector<1x256xi1>
    %68 = vector.broadcast %67 : vector<1x256xi1> to vector<8x256xi1>
    %69 = vector.broadcast %cst_34 : f32 to vector<8x256xf32>
    %70 = arith.select %68, %66, %69 : vector<8x256xi1>, vector<8x256xf32>
    %c64 = arith.constant 64 : index
    %c0_35 = arith.constant 0 : index
    %71 = vector.load %arg5[%c64, %c0_35] : memref<72x256xf32, #tpu.memory_space<vmem>>, vector<8x256xf32>
    tpu.vector_store %arg5[%c64, %c0_35], %70 {strides = array<i32>} : memref<72x256xf32, #tpu.memory_space<vmem>>, vector<8x256xf32>,
    %c0_36 = arith.constant 0 : index
    %c0_37 = arith.constant 0 : index
    %72 = vector.load %arg2[%c0_36, %c0_37] : memref<8x72xf32, #tpu.memory_space<vmem>>, vector<8x72xf32>
    %c0_38 = arith.constant 0 : index
    %c0_39 = arith.constant 0 : index
    %73 = vector.load %arg5[%c0_38, %c0_39] : memref<72x256xf32, #tpu.memory_space<vmem>>, vector<72x256xf32>
    %cst_40 = arith.constant dense<0.000000e+00> : vector<8x256xf32>
    %74 = tpu.matmul %72, %73, %cst_40 {dimension_numbers = #tpu.dot_dimension_numbers<[1], [0], [0], [1], [0, 0, 1, 1], [], []>} : vector<8x72xf32>, vector<72x256xf32>, vector<8x256xf32> -> vector<8x256xf32>
    %cst_41 = arith.constant dense<0.000000e+00> : vector<8xf32>
    %75 = vector.multi_reduction <add>, %74, %cst_41 [1] : vector<8x256xf32> to vector<8xf32>
    %76 = vector.shape_cast %75 : vector<8xf32> to vector<8x1xf32>
    %cst_42 = arith.constant 2.560000e+02 : f32
    %77 = vector.broadcast %cst_42 : f32 to vector<8x1xf32>
    %78 = arith.divf %76, %77 : vector<8x1xf32>
    %79 = vector.broadcast %78 : vector<8x1xf32> to vector<8x256xf32>
    %80 = arith.subf %74, %79 : vector<8x256xf32>
    %81 = arith.mulf %80, %80 : vector<8x256xf32>
    %cst_43 = arith.constant dense<0.000000e+00> : vector<8xf32>
    %82 = vector.multi_reduction <add>, %81, %cst_43 [1] : vector<8x256xf32> to vector<8xf32>
    %83 = vector.shape_cast %82 : vector<8xf32> to vector<8x1xf32>
    %cst_44 = arith.constant 2.560000e+02 : f32
    %84 = vector.broadcast %cst_44 : f32 to vector<8x1xf32>
    %85 = arith.divf %83, %84 : vector<8x1xf32>
    %86 = vector.broadcast %78 : vector<8x1xf32> to vector<8x256xf32>
    %87 = arith.subf %74, %86 : vector<8x256xf32>
    %cst_45 = arith.constant 9.99999974E-6 : f32
    %88 = vector.broadcast %cst_45 : f32 to vector<8x1xf32>
    %89 = arith.addf %85, %88 : vector<8x1xf32>
    %90 = math.rsqrt %89 : vector<8x1xf32>
    %91 = vector.broadcast %90 : vector<8x1xf32> to vector<8x256xf32>
    %92 = arith.mulf %87, %91 : vector<8x256xf32>
    %cst_46 = arith.constant 0.000000e+00 : f32
    %93 = vector.broadcast %cst_46 : f32 to vector<8x256xf32>
    %94 = arith.cmpf oge, %92, %93 : vector<8x256xf32>
    %cst_47 = arith.constant 2.000000e-01 : f32
    %95 = vector.broadcast %cst_47 : f32 to vector<8x256xf32>
    %96 = arith.mulf %95, %92 : vector<8x256xf32>
    %97 = arith.select %94, %92, %96 : vector<8x256xi1>, vector<8x256xf32>
    %cst_48 = arith.constant 0.000000e+00 : f32
    %98 = vector.broadcast %cst_48 : f32 to vector<8x401xf32>
    %c0_49 = arith.constant 0 : index
    %c0_50 = arith.constant 0 : index
    %99 = vector.load %arg6[%c0_49, %c0_50] : memref<8x401xf32, #tpu.memory_space<vmem>>, vector<8x401xf32>
    tpu.vector_store %arg6[%c0_49, %c0_50], %98 {strides = array<i32>} : memref<8x401xf32, #tpu.memory_space<vmem>>, vector<8x401xf32>,
    %c0_51 = arith.constant 0 : index
    %c128_52 = arith.constant 128 : index
    %100 = vector.load %arg6[%c0_51, %c128_52] : memref<8x401xf32, #tpu.memory_space<vmem>>, vector<8x256xf32>
    tpu.vector_store %arg6[%c0_51, %c128_52], %97 {strides = array<i32>} : memref<8x401xf32, #tpu.memory_space<vmem>>, vector<8x256xf32>,
    %c0_53 = arith.constant 0 : index
    %c111_54 = arith.constant 111 : index
    %101 = vector.load %arg6[%c0_53, %c111_54] : memref<8x401xf32, #tpu.memory_space<vmem>>, vector<8x256xf32>
    %cst_55 = arith.constant 0.000000e+00 : f32
    %102 = vector.shape_cast %18 : vector<1x256xi1> to vector<1x256xi1>
    %103 = vector.broadcast %102 : vector<1x256xi1> to vector<8x256xi1>
    %104 = vector.broadcast %cst_55 : f32 to vector<8x256xf32>
    %105 = arith.select %103, %101, %104 : vector<8x256xi1>, vector<8x256xf32>
    %c0_56 = arith.constant 0 : index
    %c0_57 = arith.constant 0 : index
    %106 = vector.load %arg7[%c0_56, %c0_57] : memref<72x256xf32, #tpu.memory_space<vmem>>, vector<8x256xf32>
    tpu.vector_store %arg7[%c0_56, %c0_57], %105 {strides = array<i32>} : memref<72x256xf32, #tpu.memory_space<vmem>>, vector<8x256xf32>,
    %c0_58 = arith.constant 0 : index
    %c112_59 = arith.constant 112 : index
    %107 = vector.load %arg6[%c0_58, %c112_59] : memref<8x401xf32, #tpu.memory_space<vmem>>, vector<8x256xf32>
    %c8_60 = arith.constant 8 : index
    %c0_61 = arith.constant 0 : index
    %108 = vector.load %arg7[%c8_60, %c0_61] : memref<72x256xf32, #tpu.memory_space<vmem>>, vector<8x256xf32>
    tpu.vector_store %arg7[%c8_60, %c0_61], %107 {strides = array<i32>} : memref<72x256xf32, #tpu.memory_space<vmem>>, vector<8x256xf32>,
    %c0_62 = arith.constant 0 : index
    %c113_63 = arith.constant 113 : index
    %109 = vector.load %arg6[%c0_62, %c113_63] : memref<8x401xf32, #tpu.memory_space<vmem>>, vector<8x256xf32>
    %cst_64 = arith.constant 0.000000e+00 : f32
    %110 = vector.shape_cast %20 : vector<1x256xi1> to vector<1x256xi1>
    %111 = vector.broadcast %110 : vector<1x256xi1> to vector<8x256xi1>
    %112 = vector.broadcast %cst_64 : f32 to vector<8x256xf32>
    %113 = arith.select %111, %109, %112 : vector<8x256xi1>, vector<8x256xf32>
    %c16_65 = arith.constant 16 : index
    %c0_66 = arith.constant 0 : index
    %114 = vector.load %arg7[%c16_65, %c0_66] : memref<72x256xf32, #tpu.memory_space<vmem>>, vector<8x256xf32>
    tpu.vector_store %arg7[%c16_65, %c0_66], %113 {strides = array<i32>} : memref<72x256xf32, #tpu.memory_space<vmem>>, vector<8x256xf32>,
    %c0_67 = arith.constant 0 : index
    %c127_68 = arith.constant 127 : index
    %115 = vector.load %arg6[%c0_67, %c127_68] : memref<8x401xf32, #tpu.memory_space<vmem>>, vector<8x256xf32>
    %cst_69 = arith.constant 0.000000e+00 : f32
    %116 = vector.shape_cast %18 : vector<1x256xi1> to vector<1x256xi1>
    %117 = vector.broadcast %116 : vector<1x256xi1> to vector<8x256xi1>
    %118 = vector.broadcast %cst_69 : f32 to vector<8x256xf32>
    %119 = arith.select %117, %115, %118 : vector<8x256xi1>, vector<8x256xf32>
    %c24_70 = arith.constant 24 : index
    %c0_71 = arith.constant 0 : index
    %120 = vector.load %arg7[%c24_70, %c0_71] : memref<72x256xf32, #tpu.memory_space<vmem>>, vector<8x256xf32>
    tpu.vector_store %arg7[%c24_70, %c0_71], %119 {strides = array<i32>} : memref<72x256xf32, #tpu.memory_space<vmem>>, vector<8x256xf32>,
    %c0_72 = arith.constant 0 : index
    %c128_73 = arith.constant 128 : index
    %121 = vector.load %arg6[%c0_72, %c128_73] : memref<8x401xf32, #tpu.memory_space<vmem>>, vector<8x256xf32>
    %c32_74 = arith.constant 32 : index
    %c0_75 = arith.constant 0 : index
    %122 = vector.load %arg7[%c32_74, %c0_75] : memref<72x256xf32, #tpu.memory_space<vmem>>, vector<8x256xf32>
    tpu.vector_store %arg7[%c32_74, %c0_75], %121 {strides = array<i32>} : memref<72x256xf32, #tpu.memory_space<vmem>>, vector<8x256xf32>,
    %c0_76 = arith.constant 0 : index
    %c129_77 = arith.constant 129 : index
    %123 = vector.load %arg6[%c0_76, %c129_77] : memref<8x401xf32, #tpu.memory_space<vmem>>, vector<8x256xf32>
    %cst_78 = arith.constant 0.000000e+00 : f32
    %124 = vector.shape_cast %20 : vector<1x256xi1> to vector<1x256xi1>
    %125 = vector.broadcast %124 : vector<1x256xi1> to vector<8x256xi1>
    %126 = vector.broadcast %cst_78 : f32 to vector<8x256xf32>
    %127 = arith.select %125, %123, %126 : vector<8x256xi1>, vector<8x256xf32>
    %c40_79 = arith.constant 40 : index
    %c0_80 = arith.constant 0 : index
    %128 = vector.load %arg7[%c40_79, %c0_80] : memref<72x256xf32, #tpu.memory_space<vmem>>, vector<8x256xf32>
    tpu.vector_store %arg7[%c40_79, %c0_80], %127 {strides = array<i32>} : memref<72x256xf32, #tpu.memory_space<vmem>>, vector<8x256xf32>,
    %c0_81 = arith.constant 0 : index
    %c143_82 = arith.constant 143 : index
    %129 = vector.load %arg6[%c0_81, %c143_82] : memref<8x401xf32, #tpu.memory_space<vmem>>, vector<8x256xf32>
    %cst_83 = arith.constant 0.000000e+00 : f32
    %130 = vector.shape_cast %18 : vector<1x256xi1> to vector<1x256xi1>
    %131 = vector.broadcast %130 : vector<1x256xi1> to vector<8x256xi1>
    %132 = vector.broadcast %cst_83 : f32 to vector<8x256xf32>
    %133 = arith.select %131, %129, %132 : vector<8x256xi1>, vector<8x256xf32>
    %c48_84 = arith.constant 48 : index
    %c0_85 = arith.constant 0 : index
    %134 = vector.load %arg7[%c48_84, %c0_85] : memref<72x256xf32, #tpu.memory_space<vmem>>, vector<8x256xf32>
    tpu.vector_store %arg7[%c48_84, %c0_85], %133 {strides = array<i32>} : memref<72x256xf32, #tpu.memory_space<vmem>>, vector<8x256xf32>,
    %c0_86 = arith.constant 0 : index
    %c144_87 = arith.constant 144 : index
    %135 = vector.load %arg6[%c0_86, %c144_87] : memref<8x401xf32, #tpu.memory_space<vmem>>, vector<8x256xf32>
    %c56_88 = arith.constant 56 : index
    %c0_89 = arith.constant 0 : index
    %136 = vector.load %arg7[%c56_88, %c0_89] : memref<72x256xf32, #tpu.memory_space<vmem>>, vector<8x256xf32>
    tpu.vector_store %arg7[%c56_88, %c0_89], %135 {strides = array<i32>} : memref<72x256xf32, #tpu.memory_space<vmem>>, vector<8x256xf32>,
    %c0_90 = arith.constant 0 : index
    %c145_91 = arith.constant 145 : index
    %137 = vector.load %arg6[%c0_90, %c145_91] : memref<8x401xf32, #tpu.memory_space<vmem>>, vector<8x256xf32>
    %cst_92 = arith.constant 0.000000e+00 : f32
    %138 = vector.shape_cast %20 : vector<1x256xi1> to vector<1x256xi1>
    %139 = vector.broadcast %138 : vector<1x256xi1> to vector<8x256xi1>
    %140 = vector.broadcast %cst_92 : f32 to vector<8x256xf32>
    %141 = arith.select %139, %137, %140 : vector<8x256xi1>, vector<8x256xf32>
    %c64_93 = arith.constant 64 : index
    %c0_94 = arith.constant 0 : index
    %142 = vector.load %arg7[%c64_93, %c0_94] : memref<72x256xf32, #tpu.memory_space<vmem>>, vector<8x256xf32>
    tpu.vector_store %arg7[%c64_93, %c0_94], %141 {strides = array<i32>} : memref<72x256xf32, #tpu.memory_space<vmem>>, vector<8x256xf32>,
    %c0_95 = arith.constant 0 : index
    %c0_96 = arith.constant 0 : index
    %143 = vector.load %arg3[%c0_95, %c0_96] : memref<16x72xf32, #tpu.memory_space<vmem>>, vector<16x72xf32>
    %c0_97 = arith.constant 0 : index
    %c0_98 = arith.constant 0 : index
    %144 = vector.load %arg7[%c0_97, %c0_98] : memref<72x256xf32, #tpu.memory_space<vmem>>, vector<72x256xf32>
    %cst_99 = arith.constant dense<0.000000e+00> : vector<16x256xf32>
    %145 = tpu.matmul %143, %144, %cst_99 {dimension_numbers = #tpu.dot_dimension_numbers<[1], [0], [0], [1], [0, 0, 1, 1], [], []>} : vector<16x72xf32>, vector<72x256xf32>, vector<16x256xf32> -> vector<16x256xf32>
    %c0_100 = arith.constant 0 : index
    %c0_101 = arith.constant 0 : index
    %c0_102 = arith.constant 0 : index
    %146 = vector.load %arg4[%c0_100, %c0_101, %c0_102] : memref<1x16x256xf32, #tpu.memory_space<vmem>>, vector<1x16x256xf32>
    %147 = vector.shape_cast %146 : vector<1x16x256xf32> to vector<16x256xf32>
    %148 = vector.shape_cast %145 : vector<16x256xf32> to vector<1x16x256xf32>
    tpu.vector_store %arg4[%c0_100, %c0_101, %c0_102], %148 {strides = array<i32>} : memref<1x16x256xf32, #tpu.memory_space<vmem>>, vector<1x16x256xf32>,
    return
  }
  func.func @transform_0(%arg0: i32) -> (i32, i32, i32) {
    %c0_i32 = arith.constant 0 : i32
    %c0_i32_0 = arith.constant 0 : i32
    %c0_i32_1 = arith.constant 0 : i32
    return %arg0, %c0_i32, %c0_i32_0 : i32, i32, i32
  }
  func.func @transform_1(%arg0: i32) -> (i32, i32) {
    %c0_i32 = arith.constant 0 : i32
    %c0_i32_0 = arith.constant 0 : i32
    %c0_i32_1 = arith.constant 0 : i32
    return %c0_i32, %c0_i32_0 : i32, i32
  }
  func.func @transform_2(%arg0: i32) -> (i32, i32) {
    %c0_i32 = arith.constant 0 : i32
    %c0_i32_0 = arith.constant 0 : i32
    %c0_i32_1 = arith.constant 0 : i32
    return %c0_i32, %c0_i32_0 : i32, i32
  }
  func.func @transform_3(%arg0: i32) -> (i32, i32, i32) {
    %c0_i32 = arith.constant 0 : i32
    %c0_i32_0 = arith.constant 0 : i32
    %c0_i32_1 = arith.constant 0 : i32
    return %arg0, %c0_i32, %c0_i32_0 : i32, i32, i32
  }
}

</mosaic_0001>

<bundles_post_ra>
// kernel: nconv2d_forward.1
= control target key start
LH: loop header
LB: loop body
LE: loop exit
PB: predicated region body
PF: predicated region fallthrough
CT: control target
= control target key end

     0   :  { %s1039_s12 = smov 0   ;;  %s1282_s0 = inlined_call_operand.vmem [shape: f32[2,8,401], index: 0, kind: input, shape index: {}]   ;;  %s1283_s1 = inlined_call_operand.vmem [shape: f32[8,72], index: 1, kind: input, shape index: {}]   ;;  %s1284_s2 = inlined_call_operand.vmem [shape: f32[16,72], index: 2, kind: input, shape index: {}]   ;;  %s1285_s3 = inlined_call_operand.vmem [shape: f32[2,16,256], index: 3, kind: output, shape index: {}]  }
   0x1 LB: > { %s823_s13 = sadd.s32 4294967295, %s1007_s12   ;;  %p827_p0 = scmp.ge.s32.totalorder %s1007_s12, 1  ;;  %s1007_s12 = sphi %s1039_s12, %s13_s12  }
   0x2   : > { %p137_p1 = scmp.lt.s32.totalorder %s1007_s12, 3 }
   0x4   : > { %p138_p2 = pnand %p827_p0, %p137_p1 }
   0x5   : > { %p161_p3 = scmp.lt.s32.totalorder (!%p138_p2), %s823_s13, 1  ;;  %s1009_s18 = smov (!%p138_p2), 17   ;;  %vm218_vm0 = vcmask (!%p138_p2), 138240   ;;  %v1016_v6 = vmov (!%p138_p2), 0.0   ;;  %v171_v7 = vlaneseq (!%p138_p2)  ;;  %vm239_vm1 = vcmask (!%p138_p2), 130048   ;;  %v662_v29 = vld [vmem:[%s1284_s2 + $0x8] sm:$0xff] (!%p138_p2) }
   0x6   : > { %141 = sbr.rel (%p138_p2) target bundleno = 1056 (0x420), region = 32  ;;  %s1010_s19 = smov (!%p138_p2), 16   ;;  %465 = vmatprep.mubr.f32.mxu0 (!%p138_p2), %v1016_v6  ;;  %498 = vst.msk [vmem:[#allocation3 + $0x18] sm:$0xff] (!%p138_p2), %vm218_vm0, %v1016_v6  ;;  %751 = vmatprep.mubr.f32.mxu1 (!%p138_p2), %v1016_v6  ;;  %vm283_vm4 = vcmask (!%p138_p2), 7168   ;;  %vm1018_vm5 = vmmov (!%p138_p2), 1   ;;  %vm262_vm8 = vcmask (!%p138_p2), 121856  }
   0x7   : > { %s1011_s20 = smov (!%p138_p2), 1   ;;  %s1012_s21 = smov (!%p138_p2), 15   ;;  %v172_v8 = vand.u32 (!%p138_p2), 127, %v171_v7  ;;  %vm1287_vm13 = vcmask (!%p138_p2), 1039360   ;;  %vm350_vm14 = vcmask (!%p138_p2), 916480  }
   0x8   : > { %s1013_s22 = smov (!%p138_p2), 127   ;;  %s1014_s23 = smov (!%p138_p2), 112  }
   0x9   : > { %s1015_s24 = smov (!%p138_p2), 113   ;;  %s1017_s25 = smov (!%p138_p2), 111   ;;  %v173_v9 = vadd.s32 (!%p138_p2), 128, %v172_v8  ;;  %v178_v13 = vand.u32 (!%p138_p2), 15, %v172_v8 }
   0xb   : > { %v185_v12 = vand.u32 (!%p138_p2), 15, %v173_v9  ;;  %vm1092_vm3 = vcmp.ne.s32.totalorder (!%p138_p2), %v178_v13, 0  ;;  %vm1121_vm10 = vcmp.ne.s32.totalorder (!%p138_p2), %v178_v13, 15 }
   0xc   : > { %vm1110_vm7 = vmpackc.low (!%p138_p2), %vm1018_vm5, %vm1092_vm3 }
   0xd   : > { %s1317_s13 = smov (!%p161_p3, %s823_s13), 1  ;;  %vm1088_vm2 = vcmp.ne.s32.totalorder %v185_v12, 0  ;;  %vm1114_vm9 = vcmp.ne.s32.totalorder %v185_v12, 15  ;;  %vm1286_vm12 = vmpackc.low %vm1092_vm3, %vm1121_vm10 }
   0xe   : > { %s837_s14 = sshll.u32 %s1317_s13, 5  ;;  %vm1103_vm6 = vmpackc.low %vm1018_vm5, %vm1088_vm2 }
   0xf   : > { %s165_s17 = scalar_lea.vmem %s1282_s0, %s837_s14  ;;  %vm870_vm11 = vmpackc.low %vm1088_vm2, %vm1114_vm9  ;;  %vm1310_vm2 = vcmask 924672   ;;  %s170_s7 = scalar_lea.vmem %s1285_s3, %s837_s14 }
  0x10   : > { %v1055_v0 = vld [vmem:[%s165_s17 + $0x8] sm:$0xff]  ;;  %v1057_v1 = vld [vmem:[%s165_s17 + $0x10] sm:$0xff]  ;;  %v202_v2 = vld [vmem:[%s165_s17] sm:$0xff] }
  0x11   : > { %v929_v3 = vpack.i.bf16 %v1057_v1, %v1055_v0  ;;  %212 = vrot.lane.b32.xlu1 %v202_v2, %s1009_s18  ;;  %v298_v4 = vld [vmem:[%s165_s17 + $0x18] sm:$0xff]  ;;  %vm1153_vm15 = vmpackc.low %vm1114_vm9, %vm1018_vm5 }
  0x12   : > { %v949_v5 = vpack.i.bf16 %v298_v4, %v1057_v1 }
  0x13   : > { %930 = vrot.lane.b32.xlu0 %v929_v3, %s1009_s18 }
  0x15   : > { %233 = vrot.lane.b32.xlu1 %v202_v2, %s1010_s19 }
  0x17   : > { %935 = vrot.lane.b32.xlu0 %v929_v3, %s1010_s19 }
  0x19   : > { %945 = vrot.lane.b32.xlu1 %v929_v3, %s1011_s20 }
  0x1b   : > { %940 = vrot.lane.b32.xlu0 %v929_v3, %s1012_s21 }
  0x1d   : > { %277 = vrot.lane.b32.xlu1 %v202_v2, %s1011_s20 }
  0x1f   : > { %256 = vrot.lane.b32.xlu0 %v202_v2, %s1012_s21 }
  0x21   : > { %302 = vrot.lane.b32.xlu1 %v1055_v0, %s1013_s22 }
  0x23   : > { %950 = vrot.lane.b32.xlu0 %v949_v5, %s1013_s22 }
  0x25   : > { %960 = vrot.lane.b32.xlu1 %v949_v5, %s1014_s23 }
  0x27   : > { %955 = vrot.lane.b32.xlu0 %v949_v5, %s1015_s24 }
  0x29   : > { %344 = vrot.lane.b32.xlu1 %v1055_v0, %s1014_s23 }
  0x2b   : > { %323 = vrot.lane.b32.xlu0 %v1055_v0, %s1015_s24 }
  0x2d   : > { %367 = vrot.lane.b32.xlu1 %v298_v4, %s1017_s25 }
  0x2f   : > { %365 = vrot.lane.b32.xlu0 %v1057_v1, %s1017_s25 }
  0x33   : > { %363 = vrot.lane.b32.xlu0 %v1055_v0, %s1017_s25 }
  0x83   : > { %v213_v10 = vpop.permute.xlu1 %212 }
  0x85   : > { %v931_v11 = vpop.permute.xlu0 %930 }
  0x86   : > { %v933_v14 = vunpack.i.h.bf16 %v931_v11  ;;  %v932_v15 = vunpack.i.l.bf16 %v931_v11  ;;  %v378_v11 = vld [vmem:[%s1283_s1] sm:$0xff] }
  0x87   : > { %v234_v16 = vpop.permute.xlu1 %233 }
  0x88   : > { %v219_v22 = vsel %vm218_vm0, %v213_v10, %v932_v15  ;;  %v220_v24 = vsel %vm218_vm0, %v932_v15, %v933_v14 }
  0x89   : > { %v936_v17 = vpop.permute.xlu0 %935 }
  0x8a   : > { %v938_v19 = vunpack.i.h.bf16 %v936_v17  ;;  %v937_v20 = vunpack.i.l.bf16 %v936_v17 }
  0x8b   : > { %v946_v23 = vpop.permute.xlu1 %945 }
  0x8c   : > { %v240_v25 = vsel %vm239_vm1, %v234_v16, %v937_v20  ;;  %v948_v26 = vunpack.i.h.bf16 %v946_v23  ;;  %v947_v27 = vunpack.i.l.bf16 %v946_v23  ;;  %v241_v28 = vsel %vm239_vm1, %v937_v20, %v938_v19 }
  0x8d   : > { %v866_v30 = vpack.c.bf16 %v240_v25, %v219_v22  ;;  %v941_v31 = vpop.permute.xlu0 %940  ;;  %v863_v32 = vpack.c.bf16 %v241_v28, %v220_v24 }
  0x8e   : > { %v943_v35 = vunpack.i.h.bf16 %v941_v31  ;;  %v942_v36 = vunpack.i.l.bf16 %v941_v31  ;;  %v285_v37 = vsel %vm283_vm4, %v947_v27, %v948_v26 }
  0x8f   : > { %865 = vmatprep.subr.msk.bf16.mxu0 %vm1103_vm6, %v863_v32  ;;  %v278_v38 = vpop.permute.xlu1 %277 }
  0x90   : > { %868 = vmatpush1.bf16.msk.msra.mxu0 %vm1110_vm7, %v866_v30  ;;  %v284_v40 = vsel %vm283_vm4, %v278_v38, %v947_v27  ;;  %v264_v41 = vsel %vm262_vm8, %v942_v36, %v943_v35 }
  0x91   : > { %v257_v42 = vpop.permute.xlu0 %256  ;;  %v869_v43 = vpack.c.bf16 %v285_v37, %v264_v41 }
  0x92   : > { %v263_v44 = vsel %vm262_vm8, %v257_v42, %v942_v36 }
  0x93   : > { %v872_v45 = vpack.c.bf16 %v284_v40, %v263_v44  ;;  %871 = vmatprep.subr.msk.bf16.mxu0 %vm870_vm11, %v869_v43  ;;  %v303_v46 = vpop.permute.xlu1 %302  ;;  %v585_v40 = vld [vmem:[#allocation3 + $0x18] sm:$0xff] }
  0x95   : > { %v951_v47 = vpop.permute.xlu0 %950  ;;  %874 = vmatpush1.bf16.msk.msra.mxu0 %vm1286_vm12, %v872_v45  ;;  %vm1162_vm12 = vmpackc.low %vm1121_vm10, %vm1018_vm5  ;;  %vm1290_vm5 = vcmask 908288  }
  0x96   : > { %v953_v48 = vunpack.i.h.bf16 %v951_v47  ;;  %v952_v49 = vunpack.i.l.bf16 %v951_v47 }
  0x97   : > { %v961_v50 = vpop.permute.xlu1 %960 }
  0x98   : > { %v309_v51 = vsel %vm1287_vm13, %v303_v46, %v952_v49  ;;  %v963_v52 = vunpack.i.h.bf16 %v961_v50  ;;  %v962_v53 = vunpack.i.l.bf16 %v961_v50  ;;  %v310_v54 = vsel %vm1287_vm13, %v952_v49, %v953_v48 }
  0x99   : > { %v878_v56 = vpack.c.bf16 %v309_v51, %v1055_v0  ;;  %v956_v57 = vpop.permute.xlu0 %955  ;;  %v875_v58 = vpack.c.bf16 %v310_v54, %v1057_v1  ;;  %vm1288_vm13 = vcmask 924672  }
  0x9a   : > { %v958_v60 = vunpack.i.h.bf16 %v956_v57  ;;  %v957_v61 = vunpack.i.l.bf16 %v956_v57  ;;  %v352_v62 = vsel %vm350_vm14, %v962_v53, %v963_v52 }
  0x9b   : > { %877 = vmatprep.subr.msk.bf16.mxu0 %vm1153_vm15, %v875_v58  ;;  %v345_v63 = vpop.permute.xlu1 %344 }
  0x9c   : > { %880 = vmatpush1.bf16.msk.msra.mxu0 %vm1162_vm12, %v878_v56  ;;  %v351_v0 = vsel %vm350_vm14, %v345_v63, %v962_v53  ;;  %v331_v1 = vsel %vm1288_vm13, %v957_v61, %v958_v60 }
  0x9d   : > { %v324_v2 = vpop.permute.xlu0 %323  ;;  %v881_v3 = vpack.c.bf16 %v352_v62, %v331_v1 }
  0x9e   : > { %v330_v4 = vsel %vm1288_vm13, %v324_v2, %v957_v61  ;;  %vm1289_vm13 = vcmask 588800  }
  0x9f   : > { %v884_v5 = vpack.c.bf16 %v351_v0, %v330_v4  ;;  %883 = vmatprep.subr.msk.bf16.mxu0 %vm1103_vm6, %v881_v3  ;;  %v368_v7 = vpop.permute.xlu1 %367 }
  0xa1   : > { %v366_v8 = vpop.permute.xlu0 %365  ;;  %886 = vmatpush1.bf16.msk.msra.mxu0 %vm1110_vm7, %v884_v5 }
  0xa2   : > { %v371_v9 = vsel %vm1290_vm5, %v366_v8, %v368_v7 }
  0xa3   : > { %849 = vmatprep.subr.msk.mxu0 %vm1114_vm9, %v371_v9 }
  0xa5   : > { %v364_v10 = vpop.permute.xlu0 %363 }
  0xa6   : > { %v370_v12 = vsel %vm1290_vm5, %v364_v10, %v366_v8 }
  0xa7   : > { %850 = vmatpush1.msk.msra.mxu0 %vm1121_vm10, %v370_v12 }
  0xa8   : > { %832 = vmatmul.mubr.msk.f32.vlgmr.msra.gmra.mrb[0].mxu0 %vm1289_vm13, %v378_v11 }
 0x17b   : > { %v467_v13 = vpop.f32.mrb[0].mxu0 }
 0x17c   : > { %v469_v14 = vpop.f32.mrb[1].mxu0 }
 0x17d   : > { %v472_v15 = vadd.f32 %v469_v14, %v467_v13 }
 0x17f   : > { %473 = vadd.xlane.f32.xlu1 %v472_v15 }
 0x190   : > { %507 = vrot.lane.b32.xlu1 %v1016_v6, %s1009_s18 }
 0x194   : > { %545 = vrot.lane.b32.xlu1 %v1016_v6, %s1012_s21 }
 0x20c   : > { %v474_v16 = vpop.xlane.xlu1 %473 }
 0x20d   : > { %v476_v17 = vmul.f32 0.00390625, %v474_v16 }
 0x20f   : > { %v477_v19 = vsub.f32 %v467_v13, %v476_v17  ;;  %v478_v20 = vsub.f32 %v469_v14, %v476_v17 }
 0x210   : > { %v508_v43 = vpop.permute.xlu1 %507 }
 0x211   : > { %v479_v22 = vmul.f32 %v477_v19, %v477_v19  ;;  %v480_v23 = vmul.f32 %v478_v20, %v478_v20 }
 0x213   : > { %v481_v24 = vadd.f32 %v480_v23, %v479_v22 }
 0x214   : > { %v546_v45 = vpop.permute.xlu1 %545 }
 0x215   : > { %482 = vadd.xlane.f32.xlu0 %v481_v24 }
 0x22b   : > { %527 = vrot.lane.b32.xlu0 %v1016_v6, %s1010_s19 }
 0x22f   : > { %565 = vrot.lane.b32.xlu0 %v1016_v6, %s1011_s20 }
 0x2a2   : > { %v483_v25 = vpop.xlane.xlu0 %482 }
 0x2a3   : > { %v484_v26 = vmul.f32 0.00390625, %v483_v25 }
 0x2a5   : > { %v485_v27 = vadd.f32 1e-05, %v484_v26 }
 0x2a6   : > { %v528_v42 = vpop.permute.xlu0 %527 }
 0x2a7   : > { %999 = vrsqrt.f32 %v485_v27 }
 0x2aa   : > { %v566_v44 = vpop.permute.xlu0 %565 }
 0x2b1   : > { %v1000_v28 = vpop.eup %999 }
 0x2b2   : > { %v487_v30 = vmul.f32 %v1000_v28, %v477_v19  ;;  %v488_v31 = vmul.f32 %v1000_v28, %v478_v20 }
 0x2b4   : > { %vm489_vm13 = vcmp.ge.f32.partialorder %v487_v30, 0.0  ;;  %vm490_vm5 = vcmp.ge.f32.partialorder %v488_v31, 0.0  ;;  %v491_v32 = vmul.f32 0.2, %v487_v30  ;;  %v492_v35 = vmul.f32 0.2, %v488_v31 }
 0x2b6   : > { %v1196_v36 = vsel %vm489_vm13, %v487_v30, %v491_v32  ;;  %v1198_v37 = vsel %vm490_vm5, %v488_v31, %v492_v35 }
 0x2b7   : > { %v969_v38 = vpack.i.bf16 %v1198_v37, %v1196_v36  ;;  %v984_v41 = vpack.i.bf16 %v585_v40, %v1198_v37 }
 0x2b9   : > { %970 = vrot.lane.b32.xlu1 %v969_v38, %s1010_s19  ;;  %965 = vrot.lane.b32.xlu0 %v969_v38, %s1009_s18 }
 0x2bd   : > { %975 = vrot.lane.b32.xlu1 %v969_v38, %s1012_s21  ;;  %980 = vrot.lane.b32.xlu0 %v969_v38, %s1011_s20 }
 0x2c1   : > { %985 = vrot.lane.b32.xlu1 %v984_v41, %s1013_s22  ;;  %589 = vrot.lane.b32.xlu0 %v1196_v36, %s1013_s22 }
 0x2c5   : > { %990 = vrot.lane.b32.xlu1 %v984_v41, %s1015_s24  ;;  %995 = vrot.lane.b32.xlu0 %v984_v41, %s1014_s23 }
 0x2c9   : > { %609 = vrot.lane.b32.xlu1 %v1196_v36, %s1015_s24  ;;  %629 = vrot.lane.b32.xlu0 %v1196_v36, %s1014_s23 }
 0x2cd   : > { %649 = vrot.lane.b32.xlu1 %v1198_v37, %s1017_s25  ;;  %651 = vrot.lane.b32.xlu0 %v585_v40, %s1017_s25 }
 0x2d1   : > { %647 = vrot.lane.b32.xlu1 %v1196_v36, %s1017_s25 }
 0x32b   : > { %v966_v46 = vpop.permute.xlu0 %965  ;;  %v971_v47 = vpop.permute.xlu1 %970 }
 0x32c   : > { %v968_v48 = vunpack.i.h.bf16 %v966_v46  ;;  %v967_v49 = vunpack.i.l.bf16 %v966_v46  ;;  %v973_v50 = vunpack.i.h.bf16 %v971_v47  ;;  %v972_v51 = vunpack.i.l.bf16 %v971_v47 }
 0x32e   : > { %v514_v52 = vsel %vm218_vm0, %v967_v49, %v968_v48  ;;  %v534_v53 = vsel %vm239_vm1, %v972_v51, %v973_v50  ;;  %v513_v54 = vsel %vm218_vm0, %v508_v43, %v967_v49  ;;  %v533_v56 = vsel %vm239_vm1, %v528_v42, %v972_v51 }
 0x32f   : > { %v981_v57 = vpop.permute.xlu0 %980  ;;  %v976_v58 = vpop.permute.xlu1 %975  ;;  %v887_v60 = vpack.c.bf16 %v534_v53, %v514_v52  ;;  %v890_v61 = vpack.c.bf16 %v533_v56, %v513_v54  ;;  %vm1307_vm0 = vcmask 1039360  }
 0x330   : > { %v983_v62 = vunpack.i.h.bf16 %v981_v57  ;;  %v982_v63 = vunpack.i.l.bf16 %v981_v57  ;;  %v978_v0 = vunpack.i.h.bf16 %v976_v58  ;;  %v977_v1 = vunpack.i.l.bf16 %v976_v58  ;;  %vm1308_vm1 = vmmov %vm1307_vm0 }
 0x331   : > { %889 = vmatprep.subr.msk.bf16.mxu1 %vm1103_vm6, %v887_v60 }
 0x332   : > { %v571_v2 = vsel %vm283_vm4, %v566_v44, %v982_v63  ;;  %v572_v3 = vsel %vm283_vm4, %v982_v63, %v983_v62  ;;  %v551_v4 = vsel %vm262_vm8, %v546_v45, %v977_v1  ;;  %v552_v5 = vsel %vm262_vm8, %v977_v1, %v978_v0  ;;  %892 = vmatpush1.bf16.msk.msra.mxu1 %vm1110_vm7, %v890_v61  ;;  %vm1309_vm4 = vmpackc.low %vm1092_vm3, %vm1121_vm10 }
 0x333   : > { %v893_v7 = vpack.c.bf16 %v572_v3, %v552_v5  ;;  %v896_v8 = vpack.c.bf16 %v571_v2, %v551_v4  ;;  %v590_v9 = vpop.permute.xlu0 %589  ;;  %v986_v10 = vpop.permute.xlu1 %985  ;;  %vm1311_vm3 = vmmov %vm1310_vm2  ;;  %vm1312_vm8 = vcmask 908288  }
 0x334   : > { %v988_v11 = vunpack.i.h.bf16 %v986_v10  ;;  %v987_v12 = vunpack.i.l.bf16 %v986_v10 }
 0x335   : > { %895 = vmatprep.subr.msk.bf16.mxu1 %vm870_vm11, %v893_v7  ;;  %vm1313_vm11 = vmmov %vm1312_vm8 }
 0x336   : > { %v595_v13 = vsel %vm1307_vm0, %v590_v9, %v987_v12  ;;  %v596_v14 = vsel %vm1308_vm1, %v987_v12, %v988_v11  ;;  %898 = vmatpush1.bf16.msk.msra.mxu1 %vm1309_vm4, %v896_v8 }
 0x337   : > { %v899_v15 = vpack.c.bf16 %v596_v14, %v1198_v37  ;;  %v902_v16 = vpack.c.bf16 %v595_v13, %v1196_v36  ;;  %v996_v17 = vpop.permute.xlu0 %995  ;;  %v991_v18 = vpop.permute.xlu1 %990  ;;  %v661_v36 = vld [vmem:[%s1284_s2] sm:$0xff] }
 0x338   : > { %v998_v19 = vunpack.i.h.bf16 %v996_v17  ;;  %v997_v20 = vunpack.i.l.bf16 %v996_v17  ;;  %v993_v22 = vunpack.i.h.bf16 %v991_v18  ;;  %v992_v23 = vunpack.i.l.bf16 %v991_v18 }
 0x339   : > { %901 = vmatprep.subr.msk.bf16.mxu1 %vm1153_vm15, %v899_v15 }
 0x33a   : > { %v636_v24 = vsel %vm350_vm14, %v997_v20, %v998_v19  ;;  %v616_v21 = vsel %vm1310_vm2, %v992_v23, %v993_v22  ;;  %904 = vmatpush1.bf16.msk.msra.mxu1 %vm1162_vm12, %v902_v16 }
 0x33b   : > { %v905_v25 = vpack.c.bf16 %v636_v24, %v616_v21  ;;  %v630_v26 = vpop.permute.xlu0 %629  ;;  %v610_v27 = vpop.permute.xlu1 %609 }
 0x33c   : > { %v635_v28 = vsel %vm350_vm14, %v630_v26, %v997_v20  ;;  %v615_v30 = vsel %vm1311_vm3, %v610_v27, %v992_v23 }
 0x33d   : > { %v908_v31 = vpack.c.bf16 %v635_v28, %v615_v30  ;;  %907 = vmatprep.subr.msk.bf16.mxu1 %vm1103_vm6, %v905_v25  ;;  %vm1314_vm6 = vcmask 588800  }
 0x33f   : > { %v652_v55 = vpop.permute.xlu0 %651  ;;  %v650_v32 = vpop.permute.xlu1 %649  ;;  %910 = vmatpush1.bf16.msk.msra.mxu1 %vm1110_vm7, %v908_v31  ;;  %vm1315_vm7 = vmmov %vm1314_vm6 }
 0x340   : > { %v654_v59 = vsel %vm1312_vm8, %v650_v32, %v652_v55 }
 0x341   : > { %861 = vmatprep.subr.msk.mxu1 %vm1114_vm9, %v654_v59 }
 0x343   : > { %v648_v35 = vpop.permute.xlu1 %647 }
 0x344   : > { %v653_v37 = vsel %vm1313_vm11, %v648_v35, %v650_v32 }
 0x345   : > { %862 = vmatpush1.msk.msra.mxu1 %vm1121_vm10, %v653_v37 }
 0x346   : > { %833 = vmatmul.mubr.msk.f32.vlgmr.msra.gmra.mrb[0].mxu1 %vm1314_vm6, %v661_v36 }
 0x347   : > { %757 = vmatprep.mubr.f32.mxu1 %v1016_v6 }
 0x34a   : > { %834 = vmatmul.mubr.msk.f32.gmra.mrb[2].mxu1 %vm1315_vm7, %v662_v29 }
 0x419   : > { %v753_v33 = vpop.f32.mrb[0].mxu1 }
 0x41a   : > { %764 = vst [vmem:[%s170_s7] sm:$0xff] %v753_v33  ;;  %v755_v34 = vpop.f32.mrb[1].mxu1 }
 0x41b   : > { %765 = vst [vmem:[%s170_s7 + $0x8] sm:$0xff] %v755_v34 }
 0x41d   : > { %v759_v39 = vpop.f32.mrb[2].mxu1 }
 0x41e   : > { %766 = vst [vmem:[%s170_s7 + $0x10] sm:$0xff] %v759_v39  ;;  %v761_v38 = vpop.f32.mrb[3].mxu1 }
 0x41f   : > { %767 = vst [vmem:[%s170_s7 + $0x18] sm:$0xff] %v761_v38 }
 0x420 PF: > { %s13_s12 = sadd.s32 1, %s1007_s12  }
 0x421   : > { %p10_p4 = scmp.ge.s32.totalorder %s13_s12, 4  }
 0x423   :  { %12 = sbr.rel (!%p10_p4) target bundleno = 1 (0x1), region = 62 }

</bundles_post_ra>
